<compile_context>
chip_gen: v6e
topology: v6e:2x2x1
jax: 0.10.0
libtpu: 0.0.40
codegen_flags: <defaults>
</compile_context>

<pallas_src>
import functools
import re

import jax
import jax.numpy as jnp
from jax.experimental import pallas as pl
from jax.experimental.pallas import tpu as pltpu


# ----------------------------------------------------------------------------- config


def _round_up(x, m):
    return (x + m - 1) // m * m


def _hw_config():
    """(tpu generation, L-tile VMEM budget, vmem_limit_bytes, min #L tiles)."""
    gen = 6
    try:
        dev = jax.devices()[0]
        if dev.platform == "tpu":
            m = re.search(r"v(\d+)", dev.device_kind.lower())
            if m:
                gen = int(m.group(1))
    except Exception:
        pass
    if gen >= 7:   # 64 MiB physical VMEM, 2 TensorCores: tighter tiles, avoid grid=(1,)
        return gen, 22 * 1024 * 1024, 48 * 1024 * 1024, 4
    return gen, 40 * 1024 * 1024, 96 * 1024 * 1024, 2   # 128 MiB physical VMEM


def _choose_l_tile(L, B, cin, cinp, coutp, K, pool, mm_sz, ew_sz, st_sz,
                   budget, min_tiles):
    """L tile: multiple of pool*16 (pool windows never straddle tiles; bf16 sublane
    alignment for both the tile and the pooled tile), sized from a conservative
    stage-2 per-row working-set estimate, and split into at least `min_tiles`
    tiles when L allows (keeps both v7x TensorCores busy / enables DMA overlap)."""
    unit = pool * 16
    l_unit = _round_up(L, unit)
    row = B * (
        2 * 2 * cinp * mm_sz              # h1 input block, double-buffered
        + 2 * 2 * cin * mm_sz             # x input block (fused skip), double-buffered
        + 2 * cinp * ew_sz                # BN/LeakyReLU window temporaries
        + (K * cinp + cin) * mm_sz        # im2col columns (+ skip columns)
        + 2 * coutp * 4                   # fp32 matmul result + s_scratch
        + 2 * coutp * st_sz // pool       # pooled output block, double-buffered
    )
    tl = max(unit, budget // max(row, 1) // unit * unit)
    tl = min(tl, l_unit)
    if min_tiles > 1:
        cap = (l_unit // min_tiles) // unit * unit
        if cap >= unit:
            tl = min(tl, cap)
    return tl


# ----------------------------------------------------------------------------- kernels


def _bn_lrelu_cols(win, scale, shift, *, tile_start, seq_len, pad, k, slope,
                   out_dtype):
    """lrelu(bn(win)) with zero 'same' padding outside [0, seq_len) (PyTorch pads
    *after* BN + LeakyReLU), then the K sublane-shifted im2col views concatenated
    along lanes (one wide MXU contraction instead of K thin matmuls)."""
    b, tlw, c = win.shape
    tl = tlw - 2 * pad
    a = win * scale + shift
    a = jnp.where(a >= 0, a, jnp.asarray(slope, a.dtype) * a)
    r = jax.lax.broadcasted_iota(jnp.int32, (1, tlw, 1), 1)
    g = tile_start - pad + r
    a = jnp.where((g >= 0) & (g < seq_len), a, jnp.zeros((), a.dtype)).astype(out_dtype)
    return jnp.concatenate([a[:, j:j + tl, :] for j in range(k)], axis=-1)


def _stage1_kernel(xc_ref, lh_ref, rh_ref, scale_ref, shift_ref, w_ref,
                   h1_ref, st_ref, *, K, pad, L, slope):
    """h1 = conv1(lrelu(bn1(x))) for one L tile + partial BN2 statistics of h1."""
    i = pl.program_id(0)
    b, tl, _ = xc_ref.shape
    cinp = w_ref.shape[-1]
    scale, shift = scale_ref[...], shift_ref[...]
    win = jnp.concatenate([lh_ref[...], xc_ref[...], rh_ref[...]],
                          axis=1).astype(scale.dtype)
    cols = _bn_lrelu_cols(win, scale, shift, tile_start=i * tl, seq_len=L,
                          pad=pad, k=K, slope=slope, out_dtype=w_ref.dtype)
    h = jnp.dot(cols.reshape(b * tl, -1), w_ref[...],
                preferred_element_type=jnp.float32).reshape(b, tl, cinp)
    # Zero rows past the true length so they cannot pollute the BN2 statistics.
    l_idx = jax.lax.broadcasted_iota(jnp.int32, (1, tl, 1), 1)
    h = jnp.where(i * tl + l_idx < L, h, 0.0)
    h1_ref[...] = h.astype(h1_ref.dtype)
    h2d = h.reshape(b * tl, cinp)
    st_ref[...] = jnp.concatenate(
        [jnp.sum(h2d, axis=0, keepdims=True),
         jnp.sum(h2d * h2d, axis=0, keepdims=True)], axis=0)


def _stage2_kernel(hc_ref, lh_ref, rh_ref, xc_ref, scale_ref, shift_ref, w_ref,
                   pooled_ref, psum_ref, s_scratch, *, K, pad, L, slope, pool):
    """conv2(lrelu(bn2(h1))) with the 1x1 skip fused into the same MXU contraction,
    MaxPool1d(pool) via sublane-strided scratch reads, partial pooled sums for FMS."""
    i = pl.program_id(0)
    b, tl, _ = xc_ref.shape
    coutp = w_ref.shape[-1]
    tlp = tl // pool
    lp = L // pool
    scale, shift = scale_ref[...], shift_ref[...]
    win = jnp.concatenate([lh_ref[...], hc_ref[...], rh_ref[...]],
                          axis=1).astype(scale.dtype)
    cols = _bn_lrelu_cols(win, scale, shift, tile_start=i * tl, seq_len=L,
                          pad=pad, k=K, slope=slope, out_dtype=w_ref.dtype)
    # Fused skip: x appended as extra lane columns, wskip rows stacked under w2.
    cols = jnp.concatenate([cols, xc_ref[...].astype(w_ref.dtype)], axis=-1)
    s = jnp.dot(cols.reshape(b * tl, -1), w_ref[...],
                preferred_element_type=jnp.float32).reshape(b, tl, coutp)
    # MaxPool via `pool` sublane-strided reads of a VMEM scratch (one vectorized
    # max per tap instead of an Lp-long update loop).
    s_scratch[...] = s
    pooled = s_scratch[:, pl.ds(0, tlp, stride=pool), :]
    for j in range(1, pool):
        pooled = jnp.maximum(pooled, s_scratch[:, pl.ds(j, tlp, stride=pool), :])
    # Partial sums for the FMS global average pool; MaxPool1d drops incomplete windows.
    p_idx = jax.lax.broadcasted_iota(jnp.int32, (1, tlp, 1), 1)
    valid = (i * tlp + p_idx) < lp
    psum_ref[...] = jnp.sum(jnp.where(valid, pooled, 0.0), axis=1)
    pooled_ref[...] = pooled.astype(pooled_ref.dtype)


# ----------------------------------------------------------------------------- helpers


def _halo_views(arr, nt, tl, pad):
    """(nt, B, pad, C) left/right conv halos for each L tile of `arr` (B, nt*tl, C).
    Halos that fall outside the sequence carry junk rows which the kernels mask."""
    b, _, c = arr.shape
    t = arr.reshape(b, nt, tl, c)
    lh = jnp.transpose(jnp.roll(t[:, :, tl - pad:, :], 1, axis=1), (1, 0, 2, 3))
    rh = jnp.transpose(jnp.roll(t[:, :, :pad, :], -1, axis=1), (1, 0, 2, 3))
    return lh, rh


def _fold_bn(mean, var, gamma, beta, eps, c_pad, dtype):
    """Fold training-mode BN (biased batch stats) into per-channel scale/shift,
    zero-padded to `c_pad` lanes (padded channels map to 0 -> harmless)."""
    scale = gamma / jnp.sqrt(var + eps)
    shift = beta - mean * scale
    c = scale.shape[0]
    scale = jnp.pad(scale, (0, c_pad - c))
    shift = jnp.pad(shift, (0, c_pad - c))
    return (scale.reshape(1, 1, c_pad).astype(dtype),
            shift.reshape(1, 1, c_pad).astype(dtype))


# ----------------------------------------------------------------------------- forward


def resblock_forward(x_ncl, params, *, kernel_size=3, pool=3, slope=0.3,
                     eps=1e-5, matmul_dtype=jnp.bfloat16, l_tile=None):
    B, Cin, L = x_ncl.shape
    Cout = params["w2"].shape[0]
    K = kernel_size
    assert K % 2 == 1 and K >= 3, "odd kernel_size >= 3 required ('same' conv)"
    assert L >= pool
    pad = K // 2
    Lp = L // pool                           # MaxPool1d(pool) output length
    Cinp = _round_up(Cin, 128)               # lane-dense inter-stage channels
    Coutp = _round_up(Cout, 128)             # lane-dense output channels
    mm = jnp.dtype(matmul_dtype)

    gen, budget, vmem_limit, min_tiles = _hw_config()
    # bf16 elementwise BN/LeakyReLU on bf16-VALU chips (v6e/v7x); fp32 on v5e.
    ew = mm if (mm == jnp.dtype(jnp.bfloat16) and gen >= 6) else jnp.dtype(jnp.float32)
    store = mm                               # pooled storage dtype (HBM-traffic saver)

    TL = l_tile or _choose_l_tile(L, B, Cin, Cinp, Coutp, K, pool, mm.itemsize,
                                  ew.itemsize, store.itemsize, budget, min_tiles)
    assert TL % (pool * 16) == 0, TL         # tile & pooled tile sublane-aligned
    L_pad = _round_up(L, TL)
    nt = L_pad // TL
    TLp = TL // pool
    Lp_pad = L_pad // pool

    count = float(B * L)
    cp = pltpu.CompilerParams(dimension_semantics=("parallel",),
                              vmem_limit_bytes=vmem_limit)

    # ---- prep + BN1 statistics: fp32, fused by XLA with the transpose/pad/cast ----
    x_blc32 = jnp.transpose(x_ncl, (0, 2, 1)).astype(jnp.float32)    # (B, L, Cin)
    mean1 = jnp.mean(x_blc32, axis=(0, 1))
    var1 = jnp.mean(jnp.square(x_blc32 - mean1), axis=(0, 1))
    scale1, shift1 = _fold_bn(mean1, var1, params["g1"], params["b1"], eps, Cin, ew)
    x_blc = jnp.pad(x_blc32, ((0, 0), (0, L_pad - L), (0, 0))).astype(mm)

    # ---- weights: channels-last im2col rows, lane-padded output channels ----
    w1_mm = jnp.pad(jnp.transpose(params["w1"], (2, 1, 0)).reshape(K * Cin, Cin),
                    ((0, 0), (0, Cinp - Cin))).astype(mm)            # (K*Cin, Cinp)
    w2_kcc = jnp.pad(jnp.transpose(params["w2"], (2, 1, 0)),         # (K, Cin, Cout)
                     ((0, 0), (0, Cinp - Cin), (0, Coutp - Cout)))
    wskip = jnp.pad(jnp.transpose(params["wskip"][:, :, 0], (1, 0)),
                    ((0, 0), (0, Coutp - Cout)))
    w2s_mm = jnp.concatenate([w2_kcc.reshape(K * Cinp, Coutp), wskip],
                             axis=0).astype(mm)                      # conv2 + skip fused

    # ---- pass 1: h1 = conv1(lrelu(bn1(x))) per L tile, plus BN2 partial stats ----
    x_lh, x_rh = _halo_views(x_blc, nt, TL, pad)
    h1, stats2 = pl.pallas_call(
        functools.partial(_stage1_kernel, K=K, pad=pad, L=L, slope=slope),
        grid=(nt,),
        in_specs=[
            pl.BlockSpec((B, TL, Cin), lambda i: (0, i, 0)),
            pl.BlockSpec((None, B, pad, Cin), lambda i: (i, 0, 0, 0)),
            pl.BlockSpec((None, B, pad, Cin), lambda i: (i, 0, 0, 0)),
            pl.BlockSpec((1, 1, Cin), lambda i: (0, 0, 0)),
            pl.BlockSpec((1, 1, Cin), lambda i: (0, 0, 0)),
            pl.BlockSpec((K * Cin, Cinp), lambda i: (0, 0)),
        ],
        out_specs=(
            pl.BlockSpec((B, TL, Cinp), lambda i: (0, i, 0)),
            pl.BlockSpec((None, 2, Cinp), lambda i: (i, 0, 0)),
        ),
        out_shape=(jax.ShapeDtypeStruct((B, L_pad, Cinp), mm),
                   jax.ShapeDtypeStruct((nt, 2, Cinp), jnp.float32)),
        compiler_params=cp,
    )(x_blc, x_lh, x_rh, scale1, shift1, w1_mm)

    s2 = jnp.sum(stats2, axis=0)[:, :Cin]
    mean2 = s2[0] / count
    var2 = jnp.maximum(s2[1] / count - mean2 * mean2, 0.0)
    scale2, shift2 = _fold_bn(mean2, var2, params["g2"], params["b2"], eps, Cinp, ew)

    # ---- pass 2: conv2 + fused 1x1 skip, MaxPool1d, pooled partial sums ----
    h_lh, h_rh = _halo_views(h1, nt, TL, pad)
    pooled, psum = pl.pallas_call(
        functools.partial(_stage2_kernel, K=K, pad=pad, L=L, slope=slope, pool=pool),
        grid=(nt,),
        in_specs=[
            pl.BlockSpec((B, TL, Cinp), lambda i: (0, i, 0)),
            pl.BlockSpec((None, B, pad, Cinp), lambda i: (i, 0, 0, 0)),
            pl.BlockSpec((None, B, pad, Cinp), lambda i: (i, 0, 0, 0)),
            pl.BlockSpec((B, TL, Cin), lambda i: (0, i, 0)),
            pl.BlockSpec((1, 1, Cinp), lambda i: (0, 0, 0)),
            pl.BlockSpec((1, 1, Cinp), lambda i: (0, 0, 0)),
            pl.BlockSpec((K * Cinp + Cin, Coutp), lambda i: (0, 0)),
        ],
        out_specs=(
            pl.BlockSpec((B, TLp, Coutp), lambda i: (0, i, 0)),
            pl.BlockSpec((None, B, Coutp), lambda i: (i, 0, 0)),
        ),
        out_shape=(jax.ShapeDtypeStruct((B, Lp_pad, Coutp), store),
                   jax.ShapeDtypeStruct((nt, B, Coutp), jnp.float32)),
        scratch_shapes=[pltpu.VMEM((B, TL, Coutp), jnp.float32)],
        compiler_params=cp,
    )(h1, h_lh, h_rh, x_blc, scale2, shift2, w2s_mm)

    # ---- FMS tail in XLA, fused with the channel slice + NCL transpose ----
    m = jnp.sum(psum, axis=0)[:, :Cout] / Lp
    att = jax.nn.sigmoid(m @ params["wfc"].T + params["bfc"])[:, None, :]
    out = pooled[:, :Lp, :Cout].astype(jnp.float32) * att + att
    return jnp.transpose(out, (0, 2, 1))


# ----------------------------------------------------------------------------- reference


def ref_forward(x_ncl, params, *, kernel_size=3, pool=3, slope=0.3, eps=1e-5):
    """Pure-JAX reference mirroring the PyTorch module (smoke check)."""
    K = kernel_size
    pad = K // 2
    x = jnp.transpose(x_ncl, (0, 2, 1)).astype(jnp.float32)   # (B, L, Cin)

    def bn(h, g, b):
        mu = h.mean(axis=(0, 1), keepdims=True)
        var = ((h - mu) ** 2).mean(axis=(0, 1), keepdims=True)
        return (h - mu) / jnp.sqrt(var + eps) * g + b

    def lrelu(h):
        return jnp.where(h >= 0, h, slope * h)

    def conv(h, w_torch):                                      # (out, in, K)
        w = jnp.transpose(w_torch, (2, 1, 0))
        Lh = h.shape[1]
        hp = jnp.pad(h, ((0, 0), (pad, pad), (0, 0)))
        return sum(hp[:, k:k + Lh, :] @ w[k] for k in range(K))

    h = conv(lrelu(bn(x, params["g1"], params["b1"])), params["w1"])
    h = conv(lrelu(bn(h, params["g2"], params["b2"])), params["w2"])
    s = h + x @ params["wskip"][:, :, 0].T
    B, Lh, C = s.shape
    Lp = (Lh - pool) // pool + 1
    pooled = s[:, :Lp * pool, :].reshape(B, Lp, pool, C).max(axis=2)
    m = pooled.mean(axis=1)
    att = jax.nn.sigmoid(m @ params["wfc"].T + params["bfc"])
    out = pooled * att[:, None, :] + att[:, None, :]
    return jnp.transpose(out, (0, 2, 1))


# ----------------------------------------------------------------------------- self-check


def _make_params(key, cin, cout, K):
    ks = jax.random.split(key, 9)
    return {
        "w1": 0.3 * jax.random.normal(ks[0], (cin, cin, K), jnp.float32),
        "w2": 0.3 * jax.random.normal(ks[1], (cout, cin, K), jnp.float32),
        "wskip": 0.3 * jax.random.normal(ks[2], (cout, cin, 1), jnp.float32),
        "wfc": 0.3 * jax.random.normal(ks[3], (cout, cout), jnp.float32),
        "bfc": 0.1 * jax.random.normal(ks[4], (cout,), jnp.float32),
        "g1": 1.0 + 0.1 * jax.random.normal(ks[5], (cin,), jnp.float32),
        "b1": 0.1 * jax.random.normal(ks[6], (cin,), jnp.float32),
        "g2": 1.0 + 0.1 * jax.random.normal(ks[7], (cin,), jnp.float32),
        "b2": 0.1 * jax.random.normal(ks[8], (cin,), jnp.float32),
    }


if __name__ == "__main__":
    key = jax.random.PRNGKey(0)
    configs = [
        dict(B=2, cin=4, cout=8, L=16, K=3, l_tile=None),    # single-tile path
        dict(B=3, cin=4, cout=8, L=1000, K=5, l_tile=240),   # 5 L tiles, masked tail
    ]
    for cfg in configs:
        key, kx, kp = jax.random.split(key, 3)
        x = jax.random.normal(kx, (cfg["B"], cfg["cin"], cfg["L"]), jnp.float32)
        params = _make_params(kp, cfg["cin"], cfg["cout"], cfg["K"])
        with jax.default_matmul_precision("highest"):
            ref = jax.block_until_ready(ref_forward(x, params, kernel_size=cfg["K"]))
        # Tolerances cover MXU f32 handling plus bf16 operand/elementwise/storage
        # rounding; structural bugs produce errors >> these bounds.
        for mm, tol in ((jnp.float32, 0.10), (jnp.bfloat16, 0.35)):
            out = jax.block_until_ready(
                resblock_forward(x, params, kernel_size=cfg["K"],
                                 matmul_dtype=mm, l_tile=cfg["l_tile"]))
            assert out.shape == ref.shape, (out.shape, ref.shape)
            err = float(jnp.max(jnp.abs(out - ref)))
            assert err < tol, (cfg, str(mm), err)
    print("KERNEL_OK")
</pallas_src>

<mosaic_0001>
module attributes {stable_mosaic.version = 11 : i64} {
  func.func @_stage1_kernel(%arg0: i32, %arg1: memref<2x48x4xf32, #tpu.memory_space<vmem>>, %arg2: memref<1x2x1x4xf32, #tpu.memory_space<vmem>>, %arg3: memref<1x2x1x4xf32, #tpu.memory_space<vmem>>, %arg4: memref<1x1x4xf32, #tpu.memory_space<vmem>>, %arg5: memref<1x1x4xf32, #tpu.memory_space<vmem>>, %arg6: memref<12x128xf32, #tpu.memory_space<vmem>>, %arg7: memref<2x48x128xf32, #tpu.memory_space<vmem>>, %arg8: memref<1x2x128xf32, #tpu.memory_space<vmem>>) attributes {dimension_semantics = [#tpu.dimension_semantics<parallel>], iteration_bounds = array<i64: 1>, scalar_prefetch = 0 : i64, scratch_operands = 0 : i64, tpu.core_type = #tpu.core_type<tc>, window_params = [{transform_indices = @transform_0, window_bounds = array<i64: 2, 48, 4>}, {transform_indices = @transform_1, window_bounds = array<i64: 1, 2, 1, 4>}, {transform_indices = @transform_2, window_bounds = array<i64: 1, 2, 1, 4>}, {pipeline_mode = #tpu.pipeline_mode<synchronous>, transform_indices = @transform_3, window_bounds = array<i64: 1, 1, 4>}, {pipeline_mode = #tpu.pipeline_mode<synchronous>, transform_indices = @transform_4, window_bounds = array<i64: 1, 1, 4>}, {pipeline_mode = #tpu.pipeline_mode<synchronous>, transform_indices = @transform_5, window_bounds = array<i64: 12, 128>}, {transform_indices = @transform_6, window_bounds = array<i64: 2, 48, 128>}, {transform_indices = @transform_7, window_bounds = array<i64: 1, 2, 128>}]} {
    %c0 = arith.constant 0 : index
    %c0_0 = arith.constant 0 : index
    %c0_1 = arith.constant 0 : index
    %0 = vector.load %arg4[%c0, %c0_0, %c0_1] : memref<1x1x4xf32, #tpu.memory_space<vmem>>, vector<1x1x4xf32>
    %c0_2 = arith.constant 0 : index
    %c0_3 = arith.constant 0 : index
    %c0_4 = arith.constant 0 : index
    %1 = vector.load %arg5[%c0_2, %c0_3, %c0_4] : memref<1x1x4xf32, #tpu.memory_space<vmem>>, vector<1x1x4xf32>
    %c0_5 = arith.constant 0 : index
    %c0_6 = arith.constant 0 : index
    %c0_7 = arith.constant 0 : index
    %c0_8 = arith.constant 0 : index
    %2 = vector.load %arg2[%c0_5, %c0_6, %c0_7, %c0_8] : memref<1x2x1x4xf32, #tpu.memory_space<vmem>>, vector<1x2x1x4xf32>
    %3 = vector.shape_cast %2 : vector<1x2x1x4xf32> to vector<2x1x4xf32>
    %c0_9 = arith.constant 0 : index
    %c0_10 = arith.constant 0 : index
    %c0_11 = arith.constant 0 : index
    %4 = vector.load %arg1[%c0_9, %c0_10, %c0_11] : memref<2x48x4xf32, #tpu.memory_space<vmem>>, vector<2x48x4xf32>
    %c0_12 = arith.constant 0 : index
    %c0_13 = arith.constant 0 : index
    %c0_14 = arith.constant 0 : index
    %c0_15 = arith.constant 0 : index
    %5 = vector.load %arg3[%c0_12, %c0_13, %c0_14, %c0_15] : memref<1x2x1x4xf32, #tpu.memory_space<vmem>>, vector<1x2x1x4xf32>
    %6 = vector.shape_cast %5 : vector<1x2x1x4xf32> to vector<2x1x4xf32>
    %7 = tpu.concatenate %3, %4, %6 in 1 : vector<2x1x4xf32>, vector<2x48x4xf32>, vector<2x1x4xf32> -> vector<2x50x4xf32>
    %c48_i32 = arith.constant 48 : i32
    %8 = arith.muli %arg0, %c48_i32 : i32
    %9 = vector.broadcast %0 : vector<1x1x4xf32> to vector<2x50x4xf32>
    %10 = arith.mulf %7, %9 : vector<2x50x4xf32>
    %11 = vector.broadcast %1 : vector<1x1x4xf32> to vector<2x50x4xf32>
    %12 = arith.addf %10, %11 : vector<2x50x4xf32>
    %cst = arith.constant 0.000000e+00 : f32
    %13 = vector.broadcast %cst : f32 to vector<2x50x4xf32>
    %14 = arith.cmpf oge, %12, %13 : vector<2x50x4xf32>
    %cst_16 = arith.constant 3.000000e-01 : f32
    %15 = vector.broadcast %cst_16 : f32 to vector<2x50x4xf32>
    %16 = arith.mulf %15, %12 : vector<2x50x4xf32>
    %17 = arith.select %14, %12, %16 : vector<2x50x4xi1>, vector<2x50x4xf32>
    %18 = tpu.iota {dimensions = array<i32: 1>} : vector<1x50x1xi32>
    %c1_i32 = arith.constant 1 : i32
    %19 = arith.subi %8, %c1_i32 : i32
    %20 = vector.broadcast %19 : i32 to vector<1x50x1xi32>
    %21 = arith.addi %20, %18 : vector<1x50x1xi32>
    %c0_i32 = arith.constant 0 : i32
    %22 = vector.broadcast %c0_i32 : i32 to vector<1x50x1xi32>
    %23 = arith.cmpi sge, %21, %22 : vector<1x50x1xi32>
    %c16_i32 = arith.constant 16 : i32
    %24 = vector.broadcast %c16_i32 : i32 to vector<1x50x1xi32>
    %25 = arith.cmpi slt, %21, %24 : vector<1x50x1xi32>
    %26 = arith.andi %23, %25 : vector<1x50x1xi1>
    %cst_17 = arith.constant 0.000000e+00 : f32
    %27 = vector.shape_cast %26 : vector<1x50x1xi1> to vector<1x50x1xi1>
    %28 = vector.broadcast %27 : vector<1x50x1xi1> to vector<2x50x4xi1>
    %29 = vector.broadcast %cst_17 : f32 to vector<2x50x4xf32>
    %30 = arith.select %28, %17, %29 : vector<2x50x4xi1>, vector<2x50x4xf32>
    %31 = vector.extract_strided_slice %30 {offsets = [0, 0, 0], sizes = [2, 48, 4], strides = [1, 1, 1]} : vector<2x50x4xf32> to vector<2x48x4xf32>
    %32 = vector.extract_strided_slice %30 {offsets = [0, 1, 0], sizes = [2, 48, 4], strides = [1, 1, 1]} : vector<2x50x4xf32> to vector<2x48x4xf32>
    %33 = vector.extract_strided_slice %30 {offsets = [0, 2, 0], sizes = [2, 48, 4], strides = [1, 1, 1]} : vector<2x50x4xf32> to vector<2x48x4xf32>
    %34 = tpu.concatenate %31, %32, %33 in 2 : vector<2x48x4xf32>, vector<2x48x4xf32>, vector<2x48x4xf32> -> vector<2x48x12xf32>
    %35 = vector.shape_cast %34 : vector<2x48x12xf32> to vector<96x12xf32>
    %c0_18 = arith.constant 0 : index
    %c0_19 = arith.constant 0 : index
    %36 = vector.load %arg6[%c0_18, %c0_19] : memref<12x128xf32, #tpu.memory_space<vmem>>, vector<12x128xf32>
    %cst_20 = arith.constant dense<0.000000e+00> : vector<96x128xf32>
    %37 = tpu.matmul %35, %36, %cst_20 {dimension_numbers = #tpu.dot_dimension_numbers<[1], [0], [0], [1], [0, 0, 1, 1], [], []>} : vector<96x12xf32>, vector<12x128xf32>, vector<96x128xf32> -> vector<96x128xf32>
    %38 = vector.shape_cast %37 : vector<96x128xf32> to vector<2x48x128xf32>
    %39 = tpu.iota {dimensions = array<i32: 1>} : vector<1x48x1xi32>
    %c48_i32_21 = arith.constant 48 : i32
    %40 = arith.muli %arg0, %c48_i32_21 : i32
    %41 = vector.broadcast %40 : i32 to vector<1x48x1xi32>
    %42 = arith.addi %41, %39 : vector<1x48x1xi32>
    %c16_i32_22 = arith.constant 16 : i32
    %43 = vector.broadcast %c16_i32_22 : i32 to vector<1x48x1xi32>
    %44 = arith.cmpi slt, %42, %43 : vector<1x48x1xi32>
    %cst_23 = arith.constant 0.000000e+00 : f32
    %45 = vector.shape_cast %44 : vector<1x48x1xi1> to vector<1x48x1xi1>
    %46 = vector.broadcast %45 : vector<1x48x1xi1> to vector<2x48x128xi1>
    %47 = vector.broadcast %cst_23 : f32 to vector<2x48x128xf32>
    %48 = arith.select %46, %38, %47 : vector<2x48x128xi1>, vector<2x48x128xf32>
    %c0_24 = arith.constant 0 : index
    %c0_25 = arith.constant 0 : index
    %c0_26 = arith.constant 0 : index
    %49 = vector.load %arg7[%c0_24, %c0_25, %c0_26] : memref<2x48x128xf32, #tpu.memory_space<vmem>>, vector<2x48x128xf32>
    tpu.vector_store %arg7[%c0_24, %c0_25, %c0_26], %48 {strides = array<i32>} : memref<2x48x128xf32, #tpu.memory_space<vmem>>, vector<2x48x128xf32>,
    %50 = vector.shape_cast %48 : vector<2x48x128xf32> to vector<96x128xf32>
    %cst_27 = arith.constant dense<0.000000e+00> : vector<128xf32>
    %51 = vector.multi_reduction <add>, %50, %cst_27 [0] : vector<96x128xf32> to vector<128xf32>
    %52 = vector.shape_cast %51 : vector<128xf32> to vector<1x128xf32>
    %53 = arith.mulf %50, %50 : vector<96x128xf32>
    %cst_28 = arith.constant dense<0.000000e+00> : vector<128xf32>
    %54 = vector.multi_reduction <add>, %53, %cst_28 [0] : vector<96x128xf32> to vector<128xf32>
    %55 = vector.shape_cast %54 : vector<128xf32> to vector<1x128xf32>
    %56 = tpu.concatenate %52, %55 in 0 : vector<1x128xf32>, vector<1x128xf32> -> vector<2x128xf32>
    %c0_29 = arith.constant 0 : index
    %c0_30 = arith.constant 0 : index
    %c0_31 = arith.constant 0 : index
    %57 = vector.load %arg8[%c0_29, %c0_30, %c0_31] : memref<1x2x128xf32, #tpu.memory_space<vmem>>, vector<1x2x128xf32>
    %58 = vector.shape_cast %57 : vector<1x2x128xf32> to vector<2x128xf32>
    %59 = vector.shape_cast %56 : vector<2x128xf32> to vector<1x2x128xf32>
    tpu.vector_store %arg8[%c0_29, %c0_30, %c0_31], %59 {strides = array<i32>} : memref<1x2x128xf32, #tpu.memory_space<vmem>>, vector<1x2x128xf32>,
    return
  }
  func.func @transform_0(%arg0: i32) -> (i32, i32, i32) {
    %c0_i32 = arith.constant 0 : i32
    %c0_i32_0 = arith.constant 0 : i32
    %c0_i32_1 = arith.constant 0 : i32
    return %c0_i32, %arg0, %c0_i32_0 : i32, i32, i32
  }
  func.func @transform_1(%arg0: i32) -> (i32, i32, i32, i32) {
    %c0_i32 = arith.constant 0 : i32
    %c0_i32_0 = arith.constant 0 : i32
    %c0_i32_1 = arith.constant 0 : i32
    %c0_i32_2 = arith.constant 0 : i32
    return %arg0, %c0_i32, %c0_i32_0, %c0_i32_1 : i32, i32, i32, i32
  }
  func.func @transform_2(%arg0: i32) -> (i32, i32, i32, i32) {
    %c0_i32 = arith.constant 0 : i32
    %c0_i32_0 = arith.constant 0 : i32
    %c0_i32_1 = arith.constant 0 : i32
    %c0_i32_2 = arith.constant 0 : i32
    return %arg0, %c0_i32, %c0_i32_0, %c0_i32_1 : i32, i32, i32, i32
  }
  func.func @transform_3(%arg0: i32) -> (i32, i32, i32) {
    %c0_i32 = arith.constant 0 : i32
    %c0_i32_0 = arith.constant 0 : i32
    %c0_i32_1 = arith.constant 0 : i32
    %c0_i32_2 = arith.constant 0 : i32
    return %c0_i32, %c0_i32_0, %c0_i32_1 : i32, i32, i32
  }
  func.func @transform_4(%arg0: i32) -> (i32, i32, i32) {
    %c0_i32 = arith.constant 0 : i32
    %c0_i32_0 = arith.constant 0 : i32
    %c0_i32_1 = arith.constant 0 : i32
    %c0_i32_2 = arith.constant 0 : i32
    return %c0_i32, %c0_i32_0, %c0_i32_1 : i32, i32, i32
  }
  func.func @transform_5(%arg0: i32) -> (i32, i32) {
    %c0_i32 = arith.constant 0 : i32
    %c0_i32_0 = arith.constant 0 : i32
    %c0_i32_1 = arith.constant 0 : i32
    return %c0_i32, %c0_i32_0 : i32, i32
  }
  func.func @transform_6(%arg0: i32) -> (i32, i32, i32) {
    %c0_i32 = arith.constant 0 : i32
    %c0_i32_0 = arith.constant 0 : i32
    %c0_i32_1 = arith.constant 0 : i32
    return %c0_i32, %arg0, %c0_i32_0 : i32, i32, i32
  }
  func.func @transform_7(%arg0: i32) -> (i32, i32, i32) {
    %c0_i32 = arith.constant 0 : i32
    %c0_i32_0 = arith.constant 0 : i32
    %c0_i32_1 = arith.constant 0 : i32
    return %arg0, %c0_i32, %c0_i32_0 : i32, i32, i32
  }
}

</mosaic_0001>

<bundles_post_ra>
// kernel: tpu_custom_call.1
= control target key start
LH: loop header
LB: loop body
LE: loop exit
PB: predicated region body
PF: predicated region fallthrough
CT: control target
= control target key end

     0   :  { %13 = vsyncpa [#allocation3], 0  ;;  %v193_v1 = vlaneseq  ;;  %vm57_vm0 = vcmask 1040384   ;;  %v857_v18 = vmov 0.0   ;;  %s1063_s0 = inlined_call_operand.vmem [shape: f32[2,48,4], index: 0, kind: input, shape index: {}]   ;;  %s1064_s1 = inlined_call_operand.vmem [shape: f32[1,2,1,4], index: 1, kind: input, shape index: {}]   ;;  %s1065_s2 = inlined_call_operand.vmem [shape: f32[1,2,1,4], index: 2, kind: input, shape index: {}]   ;;  %s1066_s3 = inlined_call_operand.vmem [shape: f32[1,1,4], index: 3, kind: input, shape index: {}]   ;;  %s1067_s4 = inlined_call_operand.vmem [shape: f32[1,1,4], index: 4, kind: input, shape index: {}]   ;;  %s1068_s5 = inlined_call_operand.vmem [shape: f32[12,128], index: 5, kind: input, shape index: {}]   ;;  %s1069_s6 = inlined_call_operand.hbm [shape: f32[2,48,128], index: 6, kind: output, shape index: {0}]   ;;  %s1070_s7 = inlined_call_operand.hbm [shape: f32[1,2,128], index: 7, kind: output, shape index: {1}]  }
   0x1   :  { %v722_v0 = vld [vmem:[%s1066_s3] ss:$0 sm:$0xff]  ;;  %v32_v4 = vld [vmem:[%s1063_s0 + $0x8] sm:$0xff]  ;;  %v30_v9 = vld [vmem:[%s1064_s1 + $0x1] sm:$0x1]  ;;  %632 = vst [vmem:[#allocation2 + $0x10] sm:$0xff] %v857_v18 }
   0x2   :  { %v29_v2 = vld [vmem:[%s1064_s1] sm:$0x1]  ;;  %v59_v7 = vrot.slane %v32_v4, 7  ;;  %v194_v8 = vshrl.u32 %v193_v1, 7  ;;  %v37_v10 = vld [vmem:[%s1063_s0 + $0x30] sm:$0xff]  ;;  %v38_v11 = vld [vmem:[%s1063_s0 + $0x38] sm:$0xff] }
   0x3   :  { %v31_v3 = vld [vmem:[%s1063_s0] sm:$0xff]  ;;  %v33_v12 = vld [vmem:[%s1063_s0 + $0x10] sm:$0xff]  ;;  %v69_v16 = vrot.slane %v37_v10, 7  ;;  %633 = vst [vmem:[#allocation2 + $0x18] sm:$0xff] %v857_v18  ;;  %634 = vst [vmem:[#allocation2 + $0x20] sm:$0xff] %v857_v18 }
   0x4   :  { %v723_v5 = vld [vmem:[%s1067_s4] ss:$0 sm:$0xff]  ;;  %v58_v6 = vrot.slane %v31_v3, 7  ;;  %v203_v15 = vadd.s32 4294967295, %v194_v8  ;;  %635 = vst [vmem:[#allocation2 + $0x28] sm:$0xff] %v857_v18  ;;  %638 = vst [vmem:[#allocation2 + $0x40] sm:$0xff] %v857_v18 }
   0x5   :  { %v39_v17 = vld [vmem:[%s1063_s0 + $0x40] sm:$0xff]  ;;  %639 = vst [vmem:[#allocation2 + $0x48] sm:$0xff] %v857_v18  ;;  %640 = vst [vmem:[#allocation2 + $0x50] sm:$0xff] %v857_v18 }
   0x6   :  { %v60_v13 = vsel %vm57_vm0, %v58_v6, %v59_v7  ;;  %v106_v14 = vsel %vm57_vm0, %v29_v2, %v58_v6  ;;  %641 = vst [vmem:[#allocation2 + $0x58] sm:$0xff] %v857_v18 }
   0x7   :  { %14 = vsyncpa [#allocation5], 0  ;;  %v117_v19 = vmul.f32 %v722_v0, %v106_v14  ;;  %v118_v20 = vmul.f32 %v722_v0, %v60_v13  ;;  %v70_v21 = vrot.slane %v38_v11, 7  ;;  %v61_v22 = vrot.slane %v33_v12, 7  ;;  %s858_s0 = smov 8   ;;  %s859_s17 = smov 4  }
   0x8   :  { %vm336_vm1 = vcmask 1045504   ;;  %v107_v23 = vsel %vm57_vm0, %v30_v9, %v69_v16  ;;  %v196_v24 = vadd.s32 16, %v194_v8  ;;  %v72_v25 = vrot.slane %v39_v17, 7  ;;  %v425_v11 = vld [vmem:[%s1068_s5] sm:$0xff] }
   0x9   :  { %v137_v26 = vadd.f32 %v723_v5, %v117_v19  ;;  %v138_v27 = vadd.f32 %v723_v5, %v118_v20  ;;  %v71_v28 = vsel %vm57_vm0, %v69_v16, %v70_v21  ;;  %v124_v29 = vmul.f32 %v722_v0, %v107_v23 }
   0xa   :  { %vm210_vm2 = vcmp.ge.s32.totalorder %v203_v15, 0  ;;  %v125_v30 = vmul.f32 %v722_v0, %v71_v28  ;;  %v62_v31 = vsel %vm57_vm0, %v59_v7, %v61_v22  ;;  %v73_v32 = vsel %vm57_vm0, %v70_v21, %v72_v25  ;;  %v426_v7 = vld [vmem:[%s1068_s5 + $0x8] sm:$0xf]  ;;  %s860_s5 = smov [#allocation2]  }
   0xb   :  { %vm151_vm3 = vcmp.ge.f32.partialorder %v137_v26, 0.0  ;;  %vm152_vm4 = vcmp.ge.f32.partialorder %v138_v27, 0.0  ;;  %v165_v33 = vmul.f32 0.3, %v137_v26  ;;  %v166_v34 = vmul.f32 0.3, %v138_v27 }
   0xc   :  { %vm273_vm5 = vcmask 1046528   ;;  %v144_v35 = vadd.f32 %v723_v5, %v124_v29  ;;  %v145_v36 = vadd.f32 %v723_v5, %v125_v30  ;;  %v119_v37 = vmul.f32 %v722_v0, %v62_v31  ;;  %s695_s22 = sshll.u32 %s860_s5, 4  ;;  %s696_s22 = int_to_ptr.vmem [resolvable:$true] %s695_s22 }
   0xd   :  { %v179_v38 = vsel %vm151_vm3, %v137_v26, %v165_v33  ;;  %v947_v39 = vsel %vm152_vm4, %v138_v27, %v166_v34  ;;  %v205_v40 = vadd.s32 4294967295, %v196_v24  ;;  %v126_v41 = vmul.f32 %v722_v0, %v73_v32  ;;  %s813_s23 = scalar_lea.vmem %s696_s22, 1536  ;;  %p818_p1 = scmp.lt.s32.totalorder %s696_s22, %s696_s22 }
   0xe   :  { %v950_v42 = vsel %vm210_vm2, %v179_v38, 0.0  ;;  %v338_v43 = vrot.slane %v947_v39, 2  ;;  %v275_v44 = vrot.slane %v947_v39, 1  ;;  %vm158_vm6 = vcmp.ge.f32.partialorder %v144_v35, 0.0  ;;  %p814_p0 = scmp.ne.s32.totalorder %s696_s22, %s813_s23  ;;  %p819_p2 = scmp.lt.s32.totalorder %s813_s23, %s813_s23 }
   0xf   :  { %v337_v45 = vrot.slane %v950_v42, 2  ;;  %v274_v46 = vrot.slane %v950_v42, 1  ;;  %vm159_vm7 = vcmp.ge.f32.partialorder %v145_v36, 0.0  ;;  %v172_v47 = vmul.f32 0.3, %v144_v35 }
  0x10   :  { %v173_v48 = vmul.f32 0.3, %v145_v36  ;;  %v139_v49 = vadd.f32 %v723_v5, %v119_v37  ;;  %v146_v50 = vadd.f32 %v723_v5, %v126_v41  ;;  %vm219_vm8 = vcmp.lt.s32.totalorder %v205_v40, 16  ;;  %p820_p3 = por %p819_p2, %p818_p1 }
  0x11   :  { %v339_v51 = vsel %vm336_vm1, %v337_v45, %v338_v43  ;;  %v276_v52 = vsel %vm273_vm5, %v274_v46, %v275_v44  ;;  %v186_v53 = vsel %vm158_vm6, %v144_v35, %v172_v47  ;;  %vm464_vm11 = vcmask 1043456  }
  0x12   :  { %363 = vrot.lane.b32.xlu1 %v339_v51, %s858_s0  ;;  %300 = vrot.lane.b32.xlu0 %v276_v52, %s859_s17  ;;  %v960_v54 = vsel %vm159_vm7, %v145_v36, %v173_v48  ;;  %v963_v55 = vsel %vm210_vm2, %v186_v53, 0.0  ;;  %vm153_vm9 = vcmp.ge.f32.partialorder %v139_v49, 0.0  ;;  %v167_v56 = vmul.f32 0.3, %v139_v49  ;;  %p821_p4 = pnand %p820_p3, %p814_p0 }
  0x13   :  { %v287_v57 = vrot.slane %v963_v55, 1  ;;  %v288_v58 = vrot.slane %v960_v54, 1  ;;  %vm160_vm10 = vcmp.ge.f32.partialorder %v146_v50, 0.0  ;;  %v174_v59 = vmul.f32 0.3, %v146_v50  ;;  %751 = vmatprep.subr.msk.mxu0 %vm464_vm11, %v426_v7  ;;  %773 = vmatprep.subr.msk.mxu1 %vm464_vm11, %v426_v7 }
  0x14   :  { %v181_v60 = vsel %vm153_vm9, %v139_v49, %v167_v56  ;;  %v351_v4 = vrot.slane %v960_v54, 2  ;;  %v350_v10 = vrot.slane %v963_v55, 2  ;;  %v279_v13 = vrot.slane %v857_v18, 1  ;;  %752 = vmatpush3.msk.msra.mxu0 %vm464_vm11, %v426_v7  ;;  %775 = vmatpush3.msk.msra.mxu1 %vm464_vm11, %v426_v7 }
  0x15   :  { %v289_v61 = vsel %vm273_vm5, %v287_v57, %v288_v58  ;;  %v969_v62 = vsel %vm219_vm8, %v181_v60, 0.0  ;;  %v188_v63 = vsel %vm160_vm10, %v146_v50, %v174_v59  ;;  %753 = vmatprep.subr.mxu0 %v425_v11  ;;  %v342_v16 = vrot.slane %v857_v18, 2  ;;  %774 = vmatprep.subr.mxu1 %v425_v11 }
  0x16   :  { %312 = vrot.lane.b32.xlu1 %v289_v61, %s859_s17  ;;  %v277_v0 = vrot.slane %v969_v62, 1  ;;  %v974_v1 = vsel %vm219_vm8, %v188_v63, 0.0  ;;  %v340_v2 = vrot.slane %v969_v62, 2  ;;  %v352_v14 = vsel %vm336_vm1, %v350_v10, %v351_v4  ;;  %754 = vmatpush3.msra.mxu0 %v425_v11 }
  0x17   :  { %v290_v3 = vrot.slane %v974_v1, 1  ;;  %v353_v5 = vrot.slane %v974_v1, 2  ;;  %776 = vmatpush3.msra.mxu1 %v425_v11  ;;  %v783_v20 = vpack.i.bf16 %v279_v13, %v279_v13  ;;  %v788_v21 = vpack.i.bf16 %v342_v16, %v342_v16 }
  0x18   :  { %v278_v6 = vsel %vm273_vm5, %v275_v44, %v277_v0  ;;  %v341_v9 = vsel %vm336_vm1, %v338_v43, %v340_v2  ;;  %v280_v17 = vsel %vm273_vm5, %v277_v0, %v279_v13  ;;  %v343_v19 = vsel %vm336_vm1, %v340_v2, %v342_v16 }
  0x19   :  { %302 = vrot.lane.b32.xlu0 %v278_v6, %s859_s17  ;;  %v291_v8 = vsel %vm273_vm5, %v288_v58, %v290_v3  ;;  %v354_v12 = vsel %vm336_vm1, %v351_v4, %v353_v5  ;;  %v293_v15 = vsel %vm273_vm5, %v290_v3, %v279_v13  ;;  %v356_v18 = vsel %vm336_vm1, %v353_v5, %v342_v16 }
  0x1a   :  { %314 = vrot.lane.b32.xlu1 %v291_v8, %s859_s17  ;;  %vm399_vm12 = vcmask 31744   ;;  %vm412_vm13 = vcmask 64512   ;;  %vm427_vm14 = vcmask 97280  }
  0x1d   :  { %365 = vrot.lane.b32.xlu0 %v341_v9, %s858_s0 }
  0x1e   :  { %377 = vrot.lane.b32.xlu1 %v354_v12, %s858_s0 }
  0x21   :  { %375 = vrot.lane.b32.xlu0 %v352_v14, %s858_s0 }
  0x22   :  { %316 = vrot.lane.b32.xlu1 %v293_v15, %s859_s17 }
  0x25   :  { %304 = vrot.lane.b32.xlu0 %v280_v17, %s859_s17 }
  0x26   :  { %367 = vrot.lane.b32.xlu1 %v343_v19, %s858_s0 }
  0x29   :  { %784 = vrot.lane.b32.xlu0 %v783_v20, %s859_s17 }
  0x2a   :  { %789 = vrot.lane.b32.xlu1 %v788_v21, %s858_s0 }
  0x2d   :  { %379 = vrot.lane.b32.xlu0 %v356_v18, %s858_s0 }
  0x2e   :  { %799 = vrot.lane.b32.xlu1 %v783_v20, %s859_s17 }
  0x31   :  { %794 = vrot.lane.b32.xlu0 %v783_v20, %s859_s17 }
  0x32   :  { %809 = vrot.lane.b32.xlu1 %v788_v21, %s858_s0 }
  0x35   :  { %804 = vrot.lane.b32.xlu0 %v788_v21, %s858_s0 }
  0x84   :  { %v364_v22 = vpop.permute.xlu1 %363  ;;  %v301_v23 = vpop.permute.xlu0 %300 }
  0x85   :  { %v400_v24 = vsel %vm399_vm12, %v950_v42, %v301_v23 }
  0x86   :  { %v413_v25 = vsel %vm412_vm13, %v400_v24, %v364_v22 }
  0x87   :  { %755 = vmatprep.mubr.msk.f32.mxu0 %vm427_vm14, %v413_v25 }
  0x88   :  { %v313_v26 = vpop.permute.xlu1 %312 }
  0x89   :  { %v406_v34 = vsel %vm399_vm12, %v963_v55, %v313_v26 }
  0x8b   :  { %v303_v27 = vpop.permute.xlu0 %302 }
  0x8c   :  { %v315_v28 = vpop.permute.xlu1 %314  ;;  %v401_v29 = vsel %vm399_vm12, %v947_v39, %v303_v27 }
  0x8d   :  { %v407_v33 = vsel %vm399_vm12, %v960_v54, %v315_v28 }
  0x8f   :  { %v366_v30 = vpop.permute.xlu0 %365 }
  0x90   :  { %v414_v31 = vsel %vm412_vm13, %v401_v29, %v366_v30  ;;  %v378_v32 = vpop.permute.xlu1 %377 }
  0x91   :  { %756 = vmatmul.mubr.msk.f32.vlgmr.msra.gmra.mxu0 %vm427_vm14, %v414_v31  ;;  %v420_v35 = vsel %vm412_vm13, %v407_v33, %v378_v32 }
  0x93   :  { %v376_v36 = vpop.permute.xlu0 %375 }
  0x94   :  { %v419_v37 = vsel %vm412_vm13, %v406_v34, %v376_v36  ;;  %v317_v38 = vpop.permute.xlu1 %316 }
  0x95   :  { %764 = vmatprep.mubr.msk.f32.mxu1 %vm427_vm14, %v419_v37  ;;  %v408_v51 = vsel %vm399_vm12, %v974_v1, %v317_v38 }
  0x96   :  { %765 = vmatmul.mubr.msk.f32.vlgmr.msra.gmra.mxu1 %vm427_vm14, %v420_v35 }
  0x97   :  { %v305_v39 = vpop.permute.xlu0 %304 }
  0x98   :  { %v402_v40 = vsel %vm399_vm12, %v969_v62, %v305_v39  ;;  %v368_v41 = vpop.permute.xlu1 %367 }
  0x99   :  { %v415_v42 = vsel %vm412_vm13, %v402_v40, %v368_v41 }
  0x9a   :  { %758 = vmatprep.mubr.msk.f32.mxu0 %vm427_vm14, %v415_v42 }
  0x9b   :  { %v785_v43 = vpop.permute.xlu0 %784 }
  0x9c   :  { %v787_v44 = vunpack.i.h.bf16 %v785_v43  ;;  %v786_v45 = vunpack.i.l.bf16 %v785_v43  ;;  %v790_v46 = vpop.permute.xlu1 %789 }
  0x9d   :  { %v792_v47 = vunpack.i.h.bf16 %v790_v46  ;;  %v791_v48 = vunpack.i.l.bf16 %v790_v46 }
  0x9e   :  { %v409_v49 = vsel %vm399_vm12, 0.0, %v787_v44  ;;  %v403_v50 = vsel %vm399_vm12, 0.0, %v786_v45 }
  0x9f   :  { %v380_v52 = vpop.permute.xlu0 %379  ;;  %v416_v53 = vsel %vm412_vm13, %v403_v50, %v791_v48  ;;  %v422_v54 = vsel %vm412_vm13, %v409_v49, %v792_v47 }
  0xa0   :  { %v421_v55 = vsel %vm412_vm13, %v408_v51, %v380_v52  ;;  %v800_v56 = vpop.permute.xlu1 %799  ;;  %759 = vmatmul.mubr.msk.f32.gmra.mxu0 %vm427_vm14, %v416_v53 }
  0xa1   :  { %767 = vmatprep.mubr.msk.f32.mxu1 %vm427_vm14, %v421_v55  ;;  %v802_v58 = vunpack.i.h.bf16 %v800_v56  ;;  %v801_v59 = vunpack.i.l.bf16 %v800_v56 }
  0xa2   :  { %768 = vmatmul.mubr.msk.f32.gmra.mxu1 %vm427_vm14, %v422_v54 }
  0xa3   :  { %v795_v57 = vpop.permute.xlu0 %794  ;;  %v411_v2 = vsel %vm399_vm12, 0.0, %v802_v58  ;;  %v405_v3 = vsel %vm399_vm12, 0.0, %v801_v59 }
  0xa4   :  { %v810_v60 = vpop.permute.xlu1 %809  ;;  %v797_v61 = vunpack.i.h.bf16 %v795_v57  ;;  %v796_v62 = vunpack.i.l.bf16 %v795_v57 }
  0xa5   :  { %v812_v63 = vunpack.i.h.bf16 %v810_v60  ;;  %v811_v0 = vunpack.i.l.bf16 %v810_v60 }
  0xa6   :  { %v410_v6 = vsel %vm399_vm12, 0.0, %v797_v61  ;;  %v404_v7 = vsel %vm399_vm12, 0.0, %v796_v62 }
  0xa7   :  { %v805_v1 = vpop.permute.xlu0 %804  ;;  %v418_v8 = vsel %vm412_vm13, %v405_v3, %v811_v0  ;;  %v424_v9 = vsel %vm412_vm13, %v411_v2, %v812_v63 }
  0xa8   :  { %v807_v4 = vunpack.i.h.bf16 %v805_v1  ;;  %v806_v5 = vunpack.i.l.bf16 %v805_v1 }
  0xaa   :  { %v417_v10 = vsel %vm412_vm13, %v404_v7, %v806_v5  ;;  %v423_v11 = vsel %vm412_vm13, %v410_v6, %v807_v4 }
  0xab   :  { %761 = vmatprep.mubr.msk.f32.mxu0 %vm427_vm14, %v417_v10  ;;  %770 = vmatprep.mubr.msk.f32.mxu1 %vm427_vm14, %v423_v11 }
  0xac   :  { %762 = vmatmul.mubr.msk.f32.gmra.mxu0 %vm427_vm14, %v418_v8  ;;  %771 = vmatmul.mubr.msk.f32.gmra.mxu1 %vm427_vm14, %v424_v9 }
 0x151   :  { %v757_v12 = vpop.f32.mrf.mxu0 }
 0x152   :  { %631 = vst [vmem:[#allocation2 + $0x8] sm:$0xff] %v757_v12  ;;  %v660_v16 = vmul.f32 %v757_v12, %v757_v12 }
 0x153   :  { %v534_v13 = vpop.f32.mrf.mxu0 }
 0x154   :  { %630 = vst [vmem:[#allocation2] sm:$0xff] %v534_v13  ;;  %v659_v14 = vmul.f32 %v534_v13, %v534_v13  ;;  %v642_v17 = vadd.f32 %v757_v12, %v534_v13 }
 0x156   :  { %v766_v15 = vpop.f32.mrf.mxu1  ;;  %v671_v20 = vadd.f32 %v660_v16, %v659_v14 }
 0x157   :  { %637 = vst [vmem:[#allocation2 + $0x38] sm:$0xff] %v766_v15 }
 0x158   :  { %v564_v19 = vpop.f32.mrf.mxu1 }
 0x159   :  { %636 = vst [vmem:[#allocation2 + $0x30] sm:$0xff] %v564_v19  ;;  %v647_v21 = vadd.f32 %v642_v17, %v564_v19  ;;  %v665_v18 = vmul.f32 %v564_v19, %v564_v19 }
 0x15a   :  { %824 = shalt.err (!%p821_p4)
}
 0x15b   :  { %s861_s24 = smov 128   ;;  %v666_v22 = vmul.f32 %v766_v15, %v766_v15  ;;  %v648_v23 = vadd.f32 %v766_v15, %v647_v21  ;;  %v676_v24 = vadd.f32 %v671_v20, %v665_v18  ;;  %s862_s26 = smov [#allocation4]  }
 0x15c   :  { %701 = dma.vmem_to_hbm [thread:$0]  %s696_s22, 1536, %s1069_s6, [#allocation3], %s861_s24, %s861_s24, %s858_s0  }
 0x15d   :  { %v653_v25 = vrot.slane %v648_v23, 4  ;;  %v677_v26 = vadd.f32 %v676_v24, %v666_v22  ;;  %s708_s6 = sshll.u32 %s862_s26, 4  ;;  %s709_s6 = int_to_ptr.vmem [resolvable:$true] %s708_s6 }
 0x15e   :  { %s833_s27 = scalar_lea.vmem %s709_s6, 32  ;;  %p838_p6 = scmp.lt.s32.totalorder %s709_s6, %s709_s6 }
 0x15f   :  { %v654_v27 = vadd.f32 %v653_v25, %v648_v23  ;;  %v682_v28 = vrot.slane %v677_v26, 4  ;;  %p834_p5 = scmp.ne.s32.totalorder %s709_s6, %s833_s27  ;;  %p839_p7 = scmp.lt.s32.totalorder %s833_s27, %s833_s27 }
 0x160   :  { %v760_v29 = vpop.f32.mrf.mxu0 }
 0x161   :  { %v655_v30 = vrot.slane %v654_v27, 2  ;;  %v683_v31 = vadd.f32 %v682_v28, %v677_v26  ;;  %p840_p8 = por %p839_p7, %p838_p6 }
 0x162   :  { %v769_v32 = vpop.f32.mrf.mxu1  ;;  %v544_v33 = vpop.f32.mrf.mxu0 }
 0x163   :  { %v656_v34 = vadd.f32 %v655_v30, %v654_v27  ;;  %v684_v35 = vrot.slane %v683_v31, 2  ;;  %p841_p9 = pnand %p840_p8, %p834_p5 }
 0x164   :  { %v574_v36 = vpop.f32.mrf.mxu1 }
 0x165   :  { %v657_v37 = vrot.slane %v656_v34, 1  ;;  %v685_v38 = vadd.f32 %v684_v35, %v683_v31 }
 0x167   :  { %v686_v39 = vrot.slane %v685_v38, 1  ;;  %v658_v40 = vadd.f32 %v657_v37, %v656_v34 }
 0x169   :  { %v687_v41 = vadd.f32 %v686_v39, %v685_v38 }
 0x16b   :  { %v688_v42 = vsel %vm57_vm0, %v658_v40, %v687_v41 }
 0x16c   :  { %v763_v43 = vpop.f32.mrf.mxu0  ;;  %v772_v44 = vpop.f32.mrf.mxu1  ;;  %689 = vst [vmem:[#allocation4] sm:$0x3] %v688_v42 }
 0x16d   :  { %844 = shalt.err (!%p841_p9)
}
 0x16e   :  { %711 = dma.vmem_to_hbm [thread:$0]  %s709_s6, 32, %s1070_s7, [#allocation5]   ;;  %v554_v45 = vpop.f32.mrf.mxu0  ;;  %v584_v46 = vpop.f32.mrf.mxu1 }
 0x16f   :  { %853 = dma.done.wait [#allocation3], 1536  }
 0x170   :  { %854 = vsyncadd [#allocation3], 4294965760 }
 0x171   :  { %855 = dma.done.wait [#allocation5], 32  }
 0x172   :  { %856 = vsyncadd [#allocation5], 4294967264 }
 0x173   :  { %718 = vsyncpa [#allocation3], 1 }
 0x174   :  { %719 = vsyncpa [#allocation5], 1 }

</bundles_post_ra>
